<compile_context>
chip_gen: v5e
topology: v5e:2x2
jax: 0.10.0
libtpu: 0.0.40
codegen_flags: <defaults>
</compile_context>

<pallas_src>
import functools

import jax
import jax.numpy as jnp
from jax.experimental import pallas as pl
from jax.experimental.pallas import tpu as pltpu

SUBLANE = 8


def _round_up(x, m):
    return (x + m - 1) // m * m


def discrete_actor_kernel(x_ref, w1_ref, b1_ref, w2_ref, b2_ref, out_ref):
    """probs = softmax(relu(x @ W1 + b1) @ W2 + b2, axis=-1) for one batch tile."""
    # bf16 cast inside the kernel (overlapped VPU work; keeps the wrapper dispatch-free).
    x = x_ref[...].astype(jnp.bfloat16)                               # [TB, num_inputs]
    # linear1 on the MXU (bf16 in, f32 accumulate) + bias + ReLU in f32
    h = jnp.dot(x, w1_ref[...], preferred_element_type=jnp.float32) + b1_ref[...]
    h = jnp.maximum(h, 0.0)                                           # [TB, hidden] f32
    # linear2 on the MXU; narrow (num_actions-wide) logits
    logits = jnp.dot(h.astype(jnp.bfloat16), w2_ref[...],
                     preferred_element_type=jnp.float32) + b2_ref[...]
    # numerically stable softmax, exact normalization, all f32 (v5e-friendly)
    m = jnp.max(logits, axis=-1, keepdims=True)
    e = jnp.exp(logits - m)
    denom = jnp.sum(e, axis=-1, keepdims=True)
    out_ref[...] = (e / denom).astype(out_ref.dtype)


def prepare_params(w1, b1, w2, b2):
    """One-time preprocessing (hoisted out of the per-step hot path):
    bf16 weights for the MXU, f32 biases reshaped to [1, n] for broadcasting."""
    return (w1.astype(jnp.bfloat16),
            b1.astype(jnp.float32).reshape(1, -1),
            w2.astype(jnp.bfloat16),
            b2.astype(jnp.float32).reshape(1, -1))


@functools.partial(jax.jit, static_argnames=("batch_tile",))
def discrete_actor_forward(x, w1_bf, b1_f, w2_bf, b2_f, *, batch_tile=2048):
    """x: [B, num_inputs] f32; prepared params from prepare_params()
       -> probs [B, num_actions] f32."""
    B, num_inputs = x.shape
    hidden = w1_bf.shape[1]
    num_actions = w2_bf.shape[1]

    # Batch tiling: at least 2 tiles whenever the batch allows it, so the "parallel"
    # batch axis gives both v7x TensorCores work; capped at batch_tile rows per step.
    tb = min(batch_tile, _round_up(pl.cdiv(B, 2), SUBLANE))
    b_pad = _round_up(B, tb)
    x_in = jnp.pad(x, ((0, b_pad - B), (0, 0))) if b_pad != B else x
    grid = (b_pad // tb,)

    cost = pl.CostEstimate(
        flops=2 * b_pad * (num_inputs * hidden + hidden * num_actions),
        transcendentals=b_pad * num_actions,
        bytes_accessed=(x_in.size * x_in.dtype.itemsize          # x stream (f32)
                        + (w1_bf.size + w2_bf.size) * 2          # bf16 weights
                        + (hidden + num_actions) * 4             # f32 biases
                        + b_pad * num_actions * 4),              # narrow f32 output
    )

    out = pl.pallas_call(
        discrete_actor_kernel,
        out_shape=jax.ShapeDtypeStruct((b_pad, num_actions), jnp.float32),
        grid=grid,
        in_specs=[
            pl.BlockSpec((tb, num_inputs), lambda i: (i, 0)),        # x: streamed per tile
            pl.BlockSpec((num_inputs, hidden), lambda i: (0, 0)),    # W1: VMEM-resident
            pl.BlockSpec((1, hidden), lambda i: (0, 0)),             # b1: resident
            pl.BlockSpec((hidden, num_actions), lambda i: (0, 0)),   # W2: resident (narrow)
            pl.BlockSpec((1, num_actions), lambda i: (0, 0)),        # b2: resident
        ],
        out_specs=pl.BlockSpec((tb, num_actions), lambda i: (i, 0)),  # narrow output
        compiler_params=pltpu.CompilerParams(
            dimension_semantics=("parallel",)),   # shard batch tiles across v7x's 2 TCs
        cost_estimate=cost,
    )(x_in, w1_bf, b1_f, w2_bf, b2_f)

    return out[:B] if b_pad != B else out


def init_params(key, num_inputs, hidden_size, num_actions):
    """Deterministic init (uniform, PyTorch-Linear-style bounds), stored as [in, out]."""
    k1, k2, k3, k4 = jax.random.split(key, 4)
    bound1 = 1.0 / jnp.sqrt(num_inputs)
    bound2 = 1.0 / jnp.sqrt(hidden_size)
    w1 = jax.random.uniform(k1, (num_inputs, hidden_size), jnp.float32, -bound1, bound1)
    b1 = jax.random.uniform(k2, (1, hidden_size), jnp.float32, -bound1, bound1)
    w2 = jax.random.uniform(k3, (hidden_size, num_actions), jnp.float32, -bound2, bound2)
    b2 = jax.random.uniform(k4, (1, num_actions), jnp.float32, -bound2, bound2)
    return w1, b1, w2, b2


def reference_forward_f32(x, w1, b1, w2, b2):
    h = jnp.maximum(x @ w1 + b1, 0.0)
    return jax.nn.softmax(h @ w2 + b2, axis=-1)


def reference_forward_bf16(x, w1, b1, w2, b2):
    """Same numerics as the kernel: bf16 MXU inputs, f32 accumulation/elementwise."""
    xb, w1b, w2b = (a.astype(jnp.bfloat16) for a in (x, w1, w2))
    h = jnp.maximum(jnp.dot(xb, w1b, preferred_element_type=jnp.float32) + b1, 0.0)
    logits = jnp.dot(h.astype(jnp.bfloat16), w2b, preferred_element_type=jnp.float32) + b2
    return jax.nn.softmax(logits, axis=-1)


if __name__ == "__main__":
    # Small shapes consistent with the module: DiscreteActor(hidden_size=32,
    # num_inputs=16, num_actions=4), batch of 8 states.
    batch, num_inputs, hidden_size, num_actions = 8, 16, 32, 4

    key = jax.random.PRNGKey(0)
    kx, kp, kb = jax.random.split(key, 3)
    x = jax.random.normal(kx, (batch, num_inputs), jnp.float32)
    w1, b1, w2, b2 = init_params(kp, num_inputs, hidden_size, num_actions)
    params = prepare_params(w1, b1, w2, b2)   # one-time; out of the per-step hot path

    probs = jax.block_until_ready(discrete_actor_forward(x, *params))

    ref_bf16 = reference_forward_bf16(x, w1, b1, w2, b2)
    ref_f32 = reference_forward_f32(x, w1, b1, w2, b2)
    assert probs.shape == (batch, num_actions)
    assert jnp.allclose(probs, ref_bf16, atol=2e-3, rtol=2e-3)   # same-precision reference
    assert jnp.allclose(probs, ref_f32, atol=2e-2, rtol=2e-2)    # full-f32 reference
    assert jnp.allclose(jnp.sum(probs, axis=-1), 1.0, atol=1e-3)  # exact normalization now

    # Larger batch exercising the batch grid: two 512-row tiles, "parallel" axis.
    big_batch = 1024
    xb = jax.random.normal(kb, (big_batch, num_inputs), jnp.float32)
    probs_big = jax.block_until_ready(discrete_actor_forward(xb, *params))
    ref_big = reference_forward_bf16(xb, w1, b1, w2, b2)
    assert probs_big.shape == (big_batch, num_actions)
    assert jnp.allclose(probs_big, ref_big, atol=2e-3, rtol=2e-3)
    assert jnp.allclose(jnp.sum(probs_big, axis=-1), 1.0, atol=1e-3)

    # TODO(synk): select_action (Categorical sampling / saved_log_probs / rewards) is
    # training-loop bookkeeping on the host, not part of the forward hot path; not kernelized.
    print("KERNEL_OK")
</pallas_src>

<mosaic_0001>
module attributes {stable_mosaic.version = 11 : i64} {
  func.func @discrete_actor_kernel(%arg0: i32, %arg1: memref<8x16xf32, #tpu.memory_space<vmem>>, %arg2: memref<16x32xbf16, #tpu.memory_space<vmem>>, %arg3: memref<1x32xf32, #tpu.memory_space<vmem>>, %arg4: memref<32x4xbf16, #tpu.memory_space<vmem>>, %arg5: memref<1x4xf32, #tpu.memory_space<vmem>>, %arg6: memref<8x4xf32, #tpu.memory_space<vmem>>) attributes {dimension_semantics = [#tpu.dimension_semantics<parallel>], iteration_bounds = array<i64: 1>, scalar_prefetch = 0 : i64, scratch_operands = 0 : i64, tpu.core_type = #tpu.core_type<tc>, window_params = [{transform_indices = @transform_0, window_bounds = array<i64: 8, 16>}, {pipeline_mode = #tpu.pipeline_mode<synchronous>, transform_indices = @transform_1, window_bounds = array<i64: 16, 32>}, {pipeline_mode = #tpu.pipeline_mode<synchronous>, transform_indices = @transform_2, window_bounds = array<i64: 1, 32>}, {pipeline_mode = #tpu.pipeline_mode<synchronous>, transform_indices = @transform_3, window_bounds = array<i64: 32, 4>}, {pipeline_mode = #tpu.pipeline_mode<synchronous>, transform_indices = @transform_4, window_bounds = array<i64: 1, 4>}, {transform_indices = @transform_5, window_bounds = array<i64: 8, 4>}]} {
    %c0 = arith.constant 0 : index
    %c0_0 = arith.constant 0 : index
    %0 = vector.load %arg1[%c0, %c0_0] : memref<8x16xf32, #tpu.memory_space<vmem>>, vector<8x16xf32>
    %1 = arith.truncf %0 : vector<8x16xf32> to vector<8x16xbf16>
    %c0_1 = arith.constant 0 : index
    %c0_2 = arith.constant 0 : index
    %2 = vector.load %arg2[%c0_1, %c0_2] : memref<16x32xbf16, #tpu.memory_space<vmem>>, vector<16x32xbf16>
    %cst = arith.constant dense<0.000000e+00> : vector<8x32xf32>
    %3 = tpu.matmul %1, %2, %cst {dimension_numbers = #tpu.dot_dimension_numbers<[1], [0], [0], [1], [0, 0, 1, 1], [], []>} : vector<8x16xbf16>, vector<16x32xbf16>, vector<8x32xf32> -> vector<8x32xf32>
    %c0_3 = arith.constant 0 : index
    %c0_4 = arith.constant 0 : index
    %4 = vector.load %arg3[%c0_3, %c0_4] : memref<1x32xf32, #tpu.memory_space<vmem>>, vector<1x32xf32>
    %5 = vector.broadcast %4 : vector<1x32xf32> to vector<8x32xf32>
    %6 = arith.addf %3, %5 : vector<8x32xf32>
    %cst_5 = arith.constant 0.000000e+00 : f32
    %7 = vector.broadcast %cst_5 : f32 to vector<8x32xf32>
    %8 = arith.maximumf %6, %7 : vector<8x32xf32>
    %9 = arith.truncf %8 : vector<8x32xf32> to vector<8x32xbf16>
    %c0_6 = arith.constant 0 : index
    %c0_7 = arith.constant 0 : index
    %10 = vector.load %arg4[%c0_6, %c0_7] : memref<32x4xbf16, #tpu.memory_space<vmem>>, vector<32x4xbf16>
    %cst_8 = arith.constant dense<0.000000e+00> : vector<8x4xf32>
    %11 = tpu.matmul %9, %10, %cst_8 {dimension_numbers = #tpu.dot_dimension_numbers<[1], [0], [0], [1], [0, 0, 1, 1], [], []>} : vector<8x32xbf16>, vector<32x4xbf16>, vector<8x4xf32> -> vector<8x4xf32>
    %c0_9 = arith.constant 0 : index
    %c0_10 = arith.constant 0 : index
    %12 = vector.load %arg5[%c0_9, %c0_10] : memref<1x4xf32, #tpu.memory_space<vmem>>, vector<1x4xf32>
    %13 = vector.broadcast %12 : vector<1x4xf32> to vector<8x4xf32>
    %14 = arith.addf %11, %13 : vector<8x4xf32>
    %cst_11 = arith.constant dense<0xFF800000> : vector<8xf32>
    %15 = vector.multi_reduction <maximumf>, %14, %cst_11 [1] : vector<8x4xf32> to vector<8xf32>
    %16 = vector.shape_cast %15 : vector<8xf32> to vector<8x1xf32>
    %17 = vector.broadcast %16 : vector<8x1xf32> to vector<8x4xf32>
    %18 = arith.subf %14, %17 : vector<8x4xf32>
    %19 = math.exp %18 : vector<8x4xf32>
    %cst_12 = arith.constant dense<0.000000e+00> : vector<8xf32>
    %20 = vector.multi_reduction <add>, %19, %cst_12 [1] : vector<8x4xf32> to vector<8xf32>
    %21 = vector.shape_cast %20 : vector<8xf32> to vector<8x1xf32>
    %22 = vector.broadcast %21 : vector<8x1xf32> to vector<8x4xf32>
    %23 = arith.divf %19, %22 : vector<8x4xf32>
    %c0_13 = arith.constant 0 : index
    %c0_14 = arith.constant 0 : index
    %24 = vector.load %arg6[%c0_13, %c0_14] : memref<8x4xf32, #tpu.memory_space<vmem>>, vector<8x4xf32>
    tpu.vector_store %arg6[%c0_13, %c0_14], %23 {strides = array<i32>} : memref<8x4xf32, #tpu.memory_space<vmem>>, vector<8x4xf32>,
    return
  }
  func.func @transform_0(%arg0: i32) -> (i32, i32) {
    %c0_i32 = arith.constant 0 : i32
    %c0_i32_0 = arith.constant 0 : i32
    return %arg0, %c0_i32 : i32, i32
  }
  func.func @transform_1(%arg0: i32) -> (i32, i32) {
    %c0_i32 = arith.constant 0 : i32
    %c0_i32_0 = arith.constant 0 : i32
    %c0_i32_1 = arith.constant 0 : i32
    return %c0_i32, %c0_i32_0 : i32, i32
  }
  func.func @transform_2(%arg0: i32) -> (i32, i32) {
    %c0_i32 = arith.constant 0 : i32
    %c0_i32_0 = arith.constant 0 : i32
    %c0_i32_1 = arith.constant 0 : i32
    return %c0_i32, %c0_i32_0 : i32, i32
  }
  func.func @transform_3(%arg0: i32) -> (i32, i32) {
    %c0_i32 = arith.constant 0 : i32
    %c0_i32_0 = arith.constant 0 : i32
    %c0_i32_1 = arith.constant 0 : i32
    return %c0_i32, %c0_i32_0 : i32, i32
  }
  func.func @transform_4(%arg0: i32) -> (i32, i32) {
    %c0_i32 = arith.constant 0 : i32
    %c0_i32_0 = arith.constant 0 : i32
    %c0_i32_1 = arith.constant 0 : i32
    return %c0_i32, %c0_i32_0 : i32, i32
  }
  func.func @transform_5(%arg0: i32) -> (i32, i32) {
    %c0_i32 = arith.constant 0 : i32
    %c0_i32_0 = arith.constant 0 : i32
    return %arg0, %c0_i32 : i32, i32
  }
}

</mosaic_0001>

<bundles_post_ra>
// kernel: discrete_actor_forward.1
= control target key start
LH: loop header
LB: loop body
LE: loop exit
PB: predicated region body
PF: predicated region fallthrough
CT: control target
= control target key end

     0   :  { %vm35_vm0 = vcmask 130048   ;;  %vm74_vm1 = vcmask 261120   ;;  %vm91_vm2 = vcmask 31744   ;;  %s198_s1 = inlined_call_operand.vmem [shape: bf16[16,32], index: 1, kind: input, shape index: {}]   ;;  %s199_s0 = inlined_call_operand.vmem [shape: f32[8,16], index: 0, kind: input, shape index: {}]   ;;  %s200_s2 = inlined_call_operand.vmem [shape: f32[1,32], index: 2, kind: input, shape index: {}]   ;;  %s201_s4 = inlined_call_operand.vmem [shape: f32[1,4], index: 4, kind: input, shape index: {}]   ;;  %s202_s3 = inlined_call_operand.vmem [shape: bf16[32,4], index: 3, kind: input, shape index: {}]   ;;  %s203_s5 = inlined_call_operand.vmem [shape: f32[8,4], index: 5, kind: output, shape index: {}]  }
   0x1   :  { %v135_v0 = vld [vmem:[%s198_s1] sm:$0xff]  ;;  %v137_v3 = vld [vmem:[%s202_s3 + $0x8] sm:$0xff] }
   0x2   :  { %v21_v1 = vld [vmem:[%s199_s0] sm:$0xff]  ;;  %46 = vmatpush.bf16.msra.mxu0 %v135_v0  ;;  %84 = vmatpush.bf16.msra.mxu1 %v137_v3 }
   0x3   :  { %v22_v2 = vpack.c.bf16 %v21_v1, %v21_v1  ;;  %v136_v4 = vld [vmem:[%s202_s3] sm:$0xff] }
   0x4   :  { %v138_v5 = vld [vmem:[%s200_s2] ss:$0 sm:$0xff] }
   0x5   :  { %125 = vmatmul.msk.bf16.vlgmr.msra.gmra.mxu0 %vm35_vm0, %v22_v2  ;;  %v139_v11 = vld [vmem:[%s201_s4] ss:$0 sm:$0xff] }
   0x6   :  { %85 = vmatpush.bf16.msra.mxu1 %v136_v4 }
  0x82   :  { %v48_v6 = vpop.f32.mrf.mxu0 }
  0x83   :  { %v49_v7 = vadd.f32 %v138_v5, %v48_v6 }
  0x85   :  { %v52_v8 = vmax.f32 %v49_v7, 0.0 }
  0x87   :  { %v53_v9 = vpack.c.bf16 %v52_v8, %v52_v8 }
  0x89   :  { %134 = vmatmul.msk.bf16.vlgmr.msra.gmra.mxu1 %vm74_vm1, %v53_v9 }
  0x8a   :  { %v50_v10 = vpop.f32.mrf.mxu0 }
 0x106   :  { %v87_v12 = vpop.f32.mrf.mxu1 }
 0x107   :  { %v88_v13 = vadd.f32 %v139_v11, %v87_v12 }
 0x109   :  { %v92_v14 = vsel %vm91_vm2, %v88_v13, -inf }
 0x10a   :  { %93 = vmax.xlane.f32.xlu0 %v92_v14 }
 0x10e   :  { %v89_v15 = vpop.f32.mrf.mxu1 }
 0x17d   :  { %v94_v16 = vpop.xlane.xlu0 %93 }
 0x17e   :  { %v95_v17 = vsub.f32 %v88_v13, %v94_v16 }
 0x180   :  { %v96_v18 = vmul.f32 1.442695, %v95_v17 }
 0x182   :  { %140 = vpow2.f32 %v96_v18 }
 0x188   :  { %v141_v19 = vpop.eup %140 }
 0x189   :  { %v98_v20 = vsel %vm91_vm2, %v141_v19, 0.0 }
 0x18a   :  { %99 = vadd.xlane.f32.xlu0 %v98_v20 }
 0x1fd   :  { %v100_v21 = vpop.xlane.xlu0 %99 }
 0x1fe   :  { %142 = vrcp.f32 %v100_v21  ;;  %v112_v25 = vand.u32 2147483648, %v100_v21  ;;  %v110_v27 = vand.u32 2147483647, %v100_v21  ;;  %vm106_vm4 = vweird.f32 %v100_v21 }
 0x200   :  { %v113_v29 = vor.u32 1.1754944e-38, %v112_v25  ;;  %vm111_vm6 = vcmp.eq.f32.partialorder %v110_v27, 8.507059e+37 }
 0x204   :  { %v143_v22 = vpop.eup %142 }
 0x205   :  { %v102_v23 = vmul.f32 %v143_v22, %v100_v21  ;;  %vm107_vm3 = vweird.f32 %v143_v22 }
 0x206   :  { %vm108_vm5 = vmor %vm106_vm4, %vm107_vm3 }
 0x207   :  { %v103_v24 = vsub.f32 1.0, %v102_v23 }
 0x209   :  { %v104_v26 = vmul.f32 %v143_v22, %v103_v24 }
 0x20b   :  { %v105_v28 = vadd.f32 %v143_v22, %v104_v26 }
 0x20d   :  { %v109_v30 = vsel %vm108_vm5, %v143_v22, %v105_v28 }
 0x20e   :  { %v114_v31 = vsel %vm111_vm6, %v113_v29, %v109_v30 }
 0x20f   :  { %v115_v32 = vmul.f32 %v141_v19, %v114_v31 }
 0x211   :  { %116 = vst.msk [vmem:[%s203_s5] sm:$0xff] %vm91_vm2, %v115_v32 }

</bundles_post_ra>
